<compile_context>
chip_gen: v5e
topology: v5e:2x2
jax: 0.10.0
libtpu: 0.0.40
codegen_flags: <defaults>
</compile_context>

<pallas_src>
import functools

import jax
import jax.numpy as jnp
from jax.experimental import pallas as pl
from jax.experimental.pallas import tpu as pltpu


def _spatial_batch_kernel(x_ref, o_ref, *, num_frames, batches_per_step):
    # x_ref: (B, D) full flattened input, resident in VMEM (same block every
    #        grid step, so it is DMA'd from HBM only once).
    # o_ref: (batches_per_step * num_frames, D) output slab for grid step i,
    #        covering output rows [i*TB*F, (i+1)*TB*F).
    i = pl.program_id(0)
    d = o_ref.shape[1]
    for j in range(batches_per_step):  # static unroll, batches_per_step is small
        # Input batch element handled by this (step, j): b = i*TB + j.
        row = x_ref[pl.ds(i * batches_per_step + j, 1), :]           # (1, D)
        # Sublane-broadcast the single row to num_frames output rows.
        o_ref[pl.ds(j * num_frames, num_frames), :] = jnp.broadcast_to(
            row, (num_frames, d)
        )


def spatial_batch_for_video(
    context, input_context_key, num_frames, *, max_tile_bytes=2 * 1024 * 1024
):
    """Pallas equivalent of SpatialBatchForVideo.forward.

    context: dict containing `input_context_key` with array of shape [B, ...]
    num_frames: number of frames F to tile along the batch axis
    returns: new context dict with that entry replaced by an array of shape
             [B * F, ...] where out[b*F + f] == x[b].
    """
    assert input_context_key in context, (
        f"{input_context_key} not found in context."
    )
    x = context[input_context_key]
    B = x.shape[0]
    rest = x.shape[1:]
    D = 1
    for s in rest:
        D *= s
    x2 = x.reshape(B, D)  # lane-dense 2-D view; reshape is free at XLA level

    itemsize = jnp.dtype(x.dtype).itemsize

    # Pick how many input batch elements each grid step handles: the largest
    # divisor of B whose output tile fits the byte budget, while keeping at
    # least 2 grid steps when B >= 2 (so both v7x TensorCores get work).
    batches_per_step = 1
    for d in range(1, B + 1):
        if B % d:
            continue
        if d * num_frames * D * itemsize > max_tile_bytes:
            continue
        if B >= 2 and (B // d) < 2:
            continue
        batches_per_step = d
    grid = (B // batches_per_step,)

    out2 = pl.pallas_call(
        functools.partial(
            _spatial_batch_kernel,
            num_frames=num_frames,
            batches_per_step=batches_per_step,
        ),
        out_shape=jax.ShapeDtypeStruct((B * num_frames, D), x.dtype),
        grid=grid,
        in_specs=[
            # Full input as one resident block (equal to full array dims, so
            # no (8,128) alignment concerns); same block index every step.
            pl.BlockSpec((B, D), lambda i: (0, 0)),
        ],
        out_specs=pl.BlockSpec(
            (batches_per_step * num_frames, D), lambda i: (i, 0)
        ),
        compiler_params=pltpu.CompilerParams(
            dimension_semantics=("parallel",)
        ),
    )(x2)

    out = out2.reshape((B * num_frames,) + rest)

    new_context = dict(context)
    new_context[input_context_key] = out
    return new_context


if __name__ == "__main__":
    # Small shapes consistent with the module: spatial context (e.g. text
    # embeddings) of shape [B, tokens, channels], tiled to B*num_frames.
    batch = 2
    num_tokens = 8
    channels = 32          # rest = (8, 32) -> D = 256 (multiple of 128)
    num_frames = 8

    key = jax.random.PRNGKey(0)
    x = jax.random.normal(key, (batch, num_tokens, channels), dtype=jnp.float32)
    context = {"text_embeddings": x}

    new_context = spatial_batch_for_video(context, "text_embeddings", num_frames)
    out = jax.block_until_ready(new_context["text_embeddings"])

    # Reference: torch.tile + rearrange('b f ... -> (b f) ...') is exactly a
    # consecutive repeat along the batch axis.
    ref = jnp.repeat(x, num_frames, axis=0)
    assert out.shape == (batch * num_frames, num_tokens, channels)
    assert jnp.array_equal(out, ref), "kernel output mismatch vs reference"

    print("KERNEL_OK")
</pallas_src>

<mosaic_0001>
module attributes {stable_mosaic.version = 11 : i64} {
  func.func @_spatial_batch_kernel(%arg0: i32, %arg1: memref<2x256xf32, #tpu.memory_space<vmem>>, %arg2: memref<8x256xf32, #tpu.memory_space<vmem>>) attributes {dimension_semantics = [#tpu.dimension_semantics<parallel>], iteration_bounds = array<i64: 2>, scalar_prefetch = 0 : i64, scratch_operands = 0 : i64, tpu.core_type = #tpu.core_type<tc>, window_params = [{pipeline_mode = #tpu.pipeline_mode<synchronous>, transform_indices = @transform_0, window_bounds = array<i64: 2, 256>}, {transform_indices = @transform_1, window_bounds = array<i64: 8, 256>}]} {
    %c1_i32 = arith.constant 1 : i32
    %0 = arith.muli %arg0, %c1_i32 : i32
    %c0_i32 = arith.constant 0 : i32
    %1 = arith.addi %0, %c0_i32 : i32
    %2 = arith.index_cast %1 : i32 to index
    %c0 = arith.constant 0 : index
    %3 = vector.load %arg1[%2, %c0] : memref<2x256xf32, #tpu.memory_space<vmem>>, vector<1x256xf32>
    %4 = vector.shape_cast %3 : vector<1x256xf32> to vector<1x256xf32>
    %5 = vector.broadcast %4 : vector<1x256xf32> to vector<8x256xf32>
    %c0_0 = arith.constant 0 : index
    %c0_1 = arith.constant 0 : index
    %6 = vector.load %arg2[%c0_0, %c0_1] : memref<8x256xf32, #tpu.memory_space<vmem>>, vector<8x256xf32>
    tpu.vector_store %arg2[%c0_0, %c0_1], %5 {strides = array<i32>} : memref<8x256xf32, #tpu.memory_space<vmem>>, vector<8x256xf32>,
    return
  }
  func.func @transform_0(%arg0: i32) -> (i32, i32) {
    %c0_i32 = arith.constant 0 : i32
    %c0_i32_0 = arith.constant 0 : i32
    %c0_i32_1 = arith.constant 0 : i32
    return %c0_i32, %c0_i32_0 : i32, i32
  }
  func.func @transform_1(%arg0: i32) -> (i32, i32) {
    %c0_i32 = arith.constant 0 : i32
    %c0_i32_0 = arith.constant 0 : i32
    return %arg0, %c0_i32 : i32, i32
  }
}

</mosaic_0001>

<bundles_post_ra>
// kernel: tpu_custom_call.1
= control target key start
LH: loop header
LB: loop body
LE: loop exit
PB: predicated region body
PF: predicated region fallthrough
CT: control target
= control target key end

     0   :  { %6 = vsyncpa [#allocation3], 0  ;;  %s465_s0 = inlined_call_operand.hbm [shape: f32[2,256], index: 0, kind: input, shape index: {}]   ;;  %s466_s1 = inlined_call_operand.hbm [shape: f32[16,256], index: 1, kind: output, shape index: {}]  }
   0x1   :  { %7 = vsyncpa [#allocation4], 0 }
   0x2   :  { %9 = vsyncpa [#allocation4 + $0x1], 0  ;;  %s379_s6 = smov 0   ;;  %s381_s7 = smov 0  }
   0x3   :  { %s383_s8 = smov 0   ;;  %s385_s9 = smov 0  }
   0x4 LB: > { %s400_s10 = sadd.s32 4294967295, %s366_s9   ;;  %s205_s11 = sadd.s32 4294967294, %s366_s9   ;;  %s366_s9 = sphi %s385_s9, %s472_s9   ;;  %s362_s8 = sphi %s383_s8, %s471_s8   ;;  %s358_s7 = sphi %s381_s7, %s470_s7   ;;  %s354_s6 = sphi %s379_s6, %s469_s6  }
   0x5   : > { %s404_s12 = sadd.s32 1, %s366_s9   ;;  %s43_s13 = sadd.s32 1, %s362_s8 }
   0x6   : > { %s40_s14 = ssub.s32 %s366_s9, %s404_s12  ;;  %p53_p0 = scmp.ne.s32.totalorder %s362_s8, %s358_s7 }
   0x7   : > { %p41_p1 = scmp.eq.s32.totalorder %s40_s14, 0  ;;  %p54_p2 = scmp.eq.s32.totalorder %s400_s10, 1 }
   0x8   : > { %p59_p3 = scmp.ne.s32.totalorder %s358_s7, %s354_s6  ;;  %p60_p4 = scmp.eq.s32.totalorder %s205_s11, 1 }
   0x9   : > { %s415_s15 = scalar_select %p41_p1, %s362_s8, %s43_s13  }
   0xa   : > { %p417_p5 = por %p54_p2, %p53_p0  ;;  %p421_p6 = por %p60_p4, %p59_p3 }
   0xb   : > { %p206_p7 = scmp.ge.s32.totalorder %s366_s9, 1  ;;  %p67_p8 = scmp.lt.s32.totalorder %s366_s9, 3 }
   0xc   : > { %p234_p9 = scmp.eq.s32.totalorder %s400_s10, 0  ;;  %s79_s20 = sshll.u32 %s465_s0, 4  ;;  %s80_s20 = int_to_ptr.hbm [resolvable:$true] %s79_s20 }
   0xd   : > { %p68_p10 = pnand %p206_p7, %p67_p8  ;;  %s368_s21 = smov [#allocation2]  }
   0xe   : > { %s81_s22 = sshll.u32 %s368_s21, 4  ;;  %s82_s22 = int_to_ptr.vmem [resolvable:$true] %s81_s22 }
   0xf   : > { %p226_p11 = pneg %p68_p10  ;;  %94 = sbr.rel (%p68_p10) target bundleno = 39 (0x27), region = 24 }
  0x11   : > { %p227_p12 = pnand %p234_p9, %p226_p11 }
  0x13   : > { %229 = dma.hbm_to_vmem [thread:$0]  (!%p227_p12), %s80_s20, 64, %s82_s22, [#allocation3]  }
  0x14   : > { %345 = dma.done.wait (%p234_p9), [#allocation3], 64  }
  0x15   : > { %347 = vsyncadd (%p234_p9), [#allocation3], 4294967232  ;;  %s107_s23 = sand.u32 1, %s358_s7   ;;  %s110_s24 = sshra.s32 %s400_s10, 1 }
  0x16   : > { %s210_s25 = sshll.u32 %s107_s23, 4  ;;  %s113_s26 = sand.u32 1, %s400_s10 }
  0x17   : > { %s218_s27 = sshll.u32 %s110_s24, 2  ;;  %s219_s29 = sshll.u32 %s400_s10, 4 }
  0x18   : > { %s116_s28 = sadd.s32 %s218_s27, %s113_s26  ;;  %s109_s30 = scalar_lea.vmem [#allocation5], %s210_s25 }
  0x19   : > { %s140_s2 = sshll.u32 %s109_s30, 4  ;;  %s138_s5 = scalar_lea.hbm %s466_s1, %s219_s29  ;;  %s141_s2 = int_to_ptr.vmem [resolvable:$true] %s140_s2 }
  0x1a   : > { %s117_s11 = scalar_lea.vmem [#allocation2], %s116_s28  ;;  %s142_s13 = sshll.u32 %s138_s5, 4  ;;  %s143_s13 = int_to_ptr.hbm [resolvable:$true] %s142_s13 }
  0x1b   : > { %v118_v0 = vld [vmem:[%s117_s11] ss:$2 sm:$0x3]  ;;  %s127_s14 = scalar_lea.sflag [#allocation4], %s107_s23  ;;  %s314_s18 = sshra.s32 %s143_s13, 4  ;;  %s315_s18 = int_to_ptr.hbm [resolvable:$true] %s314_s18 }
  0x1c   : > { %v120_v1 = vperm.slane %v118_v0, 0  ;;  %v121_v2 = vperm.slane %v118_v0, 1  ;;  %s316_s10 = scalar_lea.hbm %s315_s18, 16  ;;  %s320_s21 = scalar_lea.hbm %s466_s1, 32 }
  0x1d   : > { %p317_p13 = scmp.ne.s32.totalorder %s315_s18, %s316_s10  ;;  %p321_p2 = scmp.lt.s32.totalorder %s315_s18, %s466_s1 }
  0x1e   : > { %124 = vst [vmem:[%s109_s30] sm:$0xff] %v120_v1  ;;  %p322_p3 = scmp.lt.s32.totalorder %s320_s21, %s316_s10 }
  0x1f   : > { %125 = vst [vmem:[%s109_s30 + $0x8] sm:$0xff] %v121_v2  ;;  %p318_p0 = pnand %p317_p13, %p417_p5 }
  0x20   : > { %p323_p4 = por %p322_p3, %p321_p2 }
  0x21   : > { %p319_p1 = pneg %p318_p0 }
  0x23   : > { %p324_p7 = pnand %p323_p4, %p319_p1 }
  0x25   : > { %327 = shalt.err (!%p324_p7)
}
  0x26   : > { %224 = dma.vmem_to_hbm [thread:$0]  (%p417_p5), %s141_s2, 256, %s143_s13, %s127_s14  }
  0x27 PF: > { %p236_p8 = scmp.ge.s32.totalorder %s366_s9, 2  ;;  %s154_s23 = sand.u32 1, %s354_s6  }
  0x28   : > { %s155_s25 = scalar_lea.sflag [#allocation4], %s154_s23 }
  0x29   : > { %p231_p9 = pnand %p236_p8, %p421_p6 }
  0x2b   : > { %p232_p10 = pneg %p231_p9 }
  0x2d   : > { %349 = dma.done.wait (%p232_p10), %s155_s25, 256  }
  0x2e   : > { %351 = vsyncadd (%p232_p10), %s155_s25, 4294967040  ;;  %p12_p11 = scmp.ge.s32.totalorder %s404_s12, 4   ;;  %s469_s6 = smov %s358_s7 }
  0x2f   : > { %s470_s7 = smov %s362_s8  ;;  %s471_s8 = smov %s415_s15 }
  0x30   : > { %s472_s9 = smov %s404_s12  ;;  %14 = sbr.rel (!%p12_p11) target bundleno = 4 (0x4), region = 62 }
  0x35   :  { %161 = vsyncpa [#allocation3], 1 }
  0x36   :  { %163 = vsyncpa [#allocation3 + $0x1], 1 }
  0x37   :  { %164 = vsyncpa [#allocation4], 1 }
  0x38   :  { %166 = vsyncpa [#allocation4 + $0x1], 1 }

</bundles_post_ra>
